<compile_context>
chip_gen: v6e
topology: v6e:2x2x1
jax: 0.10.0
libtpu: 0.0.40
codegen_flags: <defaults>
</compile_context>

<pallas_src>
import string

import jax
import jax.numpy as jnp
from jax.experimental import pallas as pl
from jax.experimental.pallas import tpu as pltpu

ALL_CHAR = string.ascii_letters + " .,;'"
N_CHAR = len(ALL_CHAR)          # 57  (input_size)
N_HIDDEN = 128                  # hidden_size
N_OUTPUT = 18                   # output_size (e.g. 18 name categories)
O_PAD = 128                     # output lanes padded to a full vreg tile


# ----------------------------- Pallas kernel -----------------------------
def rnn_seq_kernel(ids_ref,                     # SMEM (T,) int32  (scalar prefetch)
                   wi_ref,                      # VMEM (N_CHAR, H)  f32, resident
                   wh_ref,                      # VMEM (H, H)       bf16, resident
                   wo_ref,                      # VMEM (H, O_PAD)   bf16, resident
                   b_ih_ref,                    # VMEM (1, H)       f32  (bi + bh)
                   bo_ref,                      # VMEM (1, O_PAD)   f32  (-1e30 pad)
                   h0_ref,                      # VMEM (1, H)       f32
                   out_ref,                     # VMEM (1, O_PAD)   per-step block
                   hfinal_ref,                  # VMEM (1, H)       final hidden
                   h_scratch):                  # VMEM (1, H)       carried hidden
    t = pl.program_id(0)

    @pl.when(t == 0)
    def _():
        h_scratch[...] = h0_ref[...]

    # i2h applied to a one-hot row == gather of one row of the i2h weights.
    idx = ids_ref[t]
    x_row = wi_ref[pl.ds(idx, 1), :]                                  # (1, H) f32

    h_prev = h_scratch[...]                                           # (1, H) f32
    hh = jnp.dot(h_prev.astype(wh_ref.dtype), wh_ref[...],
                 preferred_element_type=jnp.float32)                  # (1, H) f32
    h_new = jnp.maximum(x_row + hh + b_ih_ref[...], 0.0)              # relu, f32
    h_scratch[...] = h_new

    logits = jnp.dot(h_new.astype(wo_ref.dtype), wo_ref[...],
                     preferred_element_type=jnp.float32) + bo_ref[...]  # (1, O_PAD)

    # Padded lanes carry a -1e30 bias -> they never win the max and their
    # exp underflows to 0, so the log-softmax over the real 18 lanes is exact.
    m = jnp.max(logits, axis=1, keepdims=True)
    z = logits - m
    lse = jnp.log(jnp.sum(jnp.exp(z), axis=1, keepdims=True))
    out_ref[...] = z - lse

    @pl.when(t == pl.num_programs(0) - 1)
    def _():
        hfinal_ref[...] = h_new


def rnn_forward_sequence(char_ids, hidden0, params):
    """Run the RNN over a whole character sequence in one pallas_call.

    char_ids: (T,) int32 character indices (the one-hot input, compressed).
    hidden0:  (1, N_HIDDEN) f32 initial hidden state.
    Returns (log_probs (T, N_OUTPUT) f32, final hidden (1, N_HIDDEN) f32).
    """
    wi, bi, wh, bh, wo, bo = params
    T = int(char_ids.shape[0])

    # Host-side prep: fold the two bias adds, pad the output dim to 128 lanes,
    # cast the matmul weights to bf16 (native single-pass MXU on v5e/v6e/v7x).
    b_comb = (bi + bh).astype(jnp.float32)                                   # (1, H)
    wo_pad = jnp.zeros((N_HIDDEN, O_PAD), jnp.float32).at[:, :N_OUTPUT].set(wo)
    bo_pad = jnp.full((1, O_PAD), -1e30, jnp.float32).at[:, :N_OUTPUT].set(bo)
    wh_b = wh.astype(jnp.bfloat16)
    wo_b = wo_pad.astype(jnp.bfloat16)

    grid_spec = pltpu.PrefetchScalarGridSpec(
        num_scalar_prefetch=1,
        grid=(T,),
        in_specs=[
            pl.BlockSpec((N_CHAR, N_HIDDEN), lambda t, ids: (0, 0)),    # wi  (resident)
            pl.BlockSpec((N_HIDDEN, N_HIDDEN), lambda t, ids: (0, 0)),  # wh  (resident)
            pl.BlockSpec((N_HIDDEN, O_PAD), lambda t, ids: (0, 0)),     # wo  (resident)
            pl.BlockSpec((1, N_HIDDEN), lambda t, ids: (0, 0)),         # bi + bh
            pl.BlockSpec((1, O_PAD), lambda t, ids: (0, 0)),            # bo (padded)
            pl.BlockSpec((1, N_HIDDEN), lambda t, ids: (0, 0)),         # h0
        ],
        out_specs=[
            # streamed per-step: (T, 1, O_PAD) array, one lane-dense (1,128)
            # tile per grid step (leading dim squeezed in the kernel view).
            pl.BlockSpec((None, 1, O_PAD), lambda t, ids: (t, 0, 0)),
            pl.BlockSpec((1, N_HIDDEN), lambda t, ids: (0, 0)),         # final hidden
        ],
        scratch_shapes=[pltpu.VMEM((1, N_HIDDEN), jnp.float32)],        # hidden carry
    )

    out_shapes = (
        jax.ShapeDtypeStruct((T, 1, O_PAD), jnp.float32),
        jax.ShapeDtypeStruct((1, N_HIDDEN), jnp.float32),
    )

    logp_pad, h_final = pl.pallas_call(
        rnn_seq_kernel,
        out_shape=out_shapes,
        grid_spec=grid_spec,
        compiler_params=pltpu.CompilerParams(
            dimension_semantics=("arbitrary",)),   # sequential recurrence
    )(char_ids.astype(jnp.int32), wi, wh_b, wo_b, b_comb, bo_pad, hidden0)

    return logp_pad[:, 0, :N_OUTPUT], h_final


# ------------------------------- glue / init -------------------------------
def char_to_index(char):
    return ALL_CHAR.find(char)


def line_to_indices(line):
    return jnp.array([char_to_index(c) for c in line], dtype=jnp.int32)


def init_params(key):
    """PyTorch-Linear-style init: U(-1/sqrt(fan_in), 1/sqrt(fan_in)).
    Weights stored (in_features, out_features) so y = x @ W + b."""
    ks = jax.random.split(key, 6)

    def lin(kw, kb, fan_in, fan_out):
        bound = 1.0 / (fan_in ** 0.5)
        w = jax.random.uniform(kw, (fan_in, fan_out), jnp.float32, -bound, bound)
        b = jax.random.uniform(kb, (1, fan_out), jnp.float32, -bound, bound)
        return w, b

    wi, bi = lin(ks[0], ks[1], N_CHAR, N_HIDDEN)      # i2h
    wh, bh = lin(ks[2], ks[3], N_HIDDEN, N_HIDDEN)    # h2h
    wo, bo = lin(ks[4], ks[5], N_HIDDEN, N_OUTPUT)    # h20
    return wi, bi, wh, bh, wo, bo


if __name__ == "__main__":
    key = jax.random.PRNGKey(0)
    params = init_params(key)

    line = "Ebuka"
    char_ids = line_to_indices(line)                  # (5,) int32
    hidden0 = jnp.zeros((1, N_HIDDEN), jnp.float32)

    log_probs, h_final = rnn_forward_sequence(char_ids, hidden0, params)
    jax.block_until_ready((log_probs, h_final))

    # sanity vs. a plain-JAX step-by-step reference (same bf16 matmul casts).
    wi, bi, wh, bh, wo, bo = params
    wh_b = wh.astype(jnp.bfloat16)
    wo_b = wo.astype(jnp.bfloat16)
    h = hidden0
    refs = []
    for t in range(len(line)):
        x_row = wi[char_ids[t]][None, :]              # i2h(one_hot) = weight row
        hh = jnp.dot(h.astype(jnp.bfloat16), wh_b,
                     preferred_element_type=jnp.float32)
        h = jnp.maximum(x_row + bi + hh + bh, 0.0)
        logits = jnp.dot(h.astype(jnp.bfloat16), wo_b,
                         preferred_element_type=jnp.float32) + bo
        refs.append(jax.nn.log_softmax(logits, axis=1))
    lp_ref = jnp.concatenate(refs, axis=0)

    assert log_probs.shape == (len(line), N_OUTPUT)
    assert h_final.shape == (1, N_HIDDEN)
    assert jnp.allclose(log_probs, lp_ref, atol=1e-2), "log_softmax mismatch"
    assert jnp.allclose(h_final, h, atol=1e-2), "hidden mismatch"

    print("KERNEL_OK")
</pallas_src>

<mosaic_0001>
module attributes {stable_mosaic.version = 11 : i64} {
  func.func @rnn_seq_kernel(%arg0: i32, %arg1: memref<5xi32, #tpu.memory_space<smem>>, %arg2: memref<57x128xf32, #tpu.memory_space<vmem>>, %arg3: memref<128x128xbf16, #tpu.memory_space<vmem>>, %arg4: memref<128x128xbf16, #tpu.memory_space<vmem>>, %arg5: memref<1x128xf32, #tpu.memory_space<vmem>>, %arg6: memref<1x128xf32, #tpu.memory_space<vmem>>, %arg7: memref<1x128xf32, #tpu.memory_space<vmem>>, %arg8: memref<1x1x128xf32, #tpu.memory_space<vmem>>, %arg9: memref<1x128xf32, #tpu.memory_space<vmem>>, %arg10: memref<1x128xf32, #tpu.memory_space<vmem>>) attributes {dimension_semantics = [#tpu.dimension_semantics<arbitrary>], iteration_bounds = array<i64: 5>, scalar_prefetch = 1 : i64, scratch_operands = 1 : i64, tpu.core_type = #tpu.core_type<tc>, window_params = [{pipeline_mode = #tpu.pipeline_mode<synchronous>, transform_indices = @transform_0, window_bounds = array<i64: 57, 128>}, {pipeline_mode = #tpu.pipeline_mode<synchronous>, transform_indices = @transform_1, window_bounds = array<i64: 128, 128>}, {pipeline_mode = #tpu.pipeline_mode<synchronous>, transform_indices = @transform_2, window_bounds = array<i64: 128, 128>}, {pipeline_mode = #tpu.pipeline_mode<synchronous>, transform_indices = @transform_3, window_bounds = array<i64: 1, 128>}, {pipeline_mode = #tpu.pipeline_mode<synchronous>, transform_indices = @transform_4, window_bounds = array<i64: 1, 128>}, {pipeline_mode = #tpu.pipeline_mode<synchronous>, transform_indices = @transform_5, window_bounds = array<i64: 1, 128>}, {transform_indices = @transform_6, window_bounds = array<i64: 1, 1, 128>}, {pipeline_mode = #tpu.pipeline_mode<synchronous>, transform_indices = @transform_7, window_bounds = array<i64: 1, 128>}]} {
    %c0_i32 = arith.constant 0 : i32
    %0 = arith.cmpi eq, %arg0, %c0_i32 : i32
    %1 = arith.extui %0 : i1 to i32
    %c0_i32_0 = arith.constant 0 : i32
    %2 = arith.cmpi ne, %1, %c0_i32_0 : i32
    scf.if %2 {
      %c0_21 = arith.constant 0 : index
      %c0_22 = arith.constant 0 : index
      %38 = vector.load %arg7[%c0_21, %c0_22] : memref<1x128xf32, #tpu.memory_space<vmem>>, vector<1x128xf32>
      %c0_23 = arith.constant 0 : index
      %c0_24 = arith.constant 0 : index
      %39 = vector.load %arg10[%c0_23, %c0_24] : memref<1x128xf32, #tpu.memory_space<vmem>>, vector<1x128xf32>
      tpu.vector_store %arg10[%c0_23, %c0_24], %38 {strides = array<i32>} : memref<1x128xf32, #tpu.memory_space<vmem>>, vector<1x128xf32>,
    } else {
    }
    %3 = arith.index_cast %arg0 : i32 to index
    %4 = memref.load %arg1[%3] : memref<5xi32, #tpu.memory_space<smem>>
    %5 = arith.index_cast %4 : i32 to index
    %c0 = arith.constant 0 : index
    %6 = vector.load %arg2[%5, %c0] : memref<57x128xf32, #tpu.memory_space<vmem>>, vector<1x128xf32>
    %c0_1 = arith.constant 0 : index
    %c0_2 = arith.constant 0 : index
    %7 = vector.load %arg10[%c0_1, %c0_2] : memref<1x128xf32, #tpu.memory_space<vmem>>, vector<1x128xf32>
    %8 = arith.truncf %7 : vector<1x128xf32> to vector<1x128xbf16>
    %c0_3 = arith.constant 0 : index
    %c0_4 = arith.constant 0 : index
    %9 = vector.load %arg3[%c0_3, %c0_4] : memref<128x128xbf16, #tpu.memory_space<vmem>>, vector<128x128xbf16>
    %cst = arith.constant dense<0.000000e+00> : vector<1x128xf32>
    %10 = tpu.matmul %8, %9, %cst {dimension_numbers = #tpu.dot_dimension_numbers<[1], [0], [0], [1], [0, 0, 1, 1], [], []>} : vector<1x128xbf16>, vector<128x128xbf16>, vector<1x128xf32> -> vector<1x128xf32>
    %11 = arith.addf %6, %10 : vector<1x128xf32>
    %c0_5 = arith.constant 0 : index
    %c0_6 = arith.constant 0 : index
    %12 = vector.load %arg5[%c0_5, %c0_6] : memref<1x128xf32, #tpu.memory_space<vmem>>, vector<1x128xf32>
    %13 = arith.addf %11, %12 : vector<1x128xf32>
    %cst_7 = arith.constant 0.000000e+00 : f32
    %14 = vector.broadcast %cst_7 : f32 to vector<1x128xf32>
    %15 = arith.maximumf %13, %14 : vector<1x128xf32>
    %c0_8 = arith.constant 0 : index
    %c0_9 = arith.constant 0 : index
    %16 = vector.load %arg10[%c0_8, %c0_9] : memref<1x128xf32, #tpu.memory_space<vmem>>, vector<1x128xf32>
    tpu.vector_store %arg10[%c0_8, %c0_9], %15 {strides = array<i32>} : memref<1x128xf32, #tpu.memory_space<vmem>>, vector<1x128xf32>,
    %17 = arith.truncf %15 : vector<1x128xf32> to vector<1x128xbf16>
    %c0_10 = arith.constant 0 : index
    %c0_11 = arith.constant 0 : index
    %18 = vector.load %arg4[%c0_10, %c0_11] : memref<128x128xbf16, #tpu.memory_space<vmem>>, vector<128x128xbf16>
    %cst_12 = arith.constant dense<0.000000e+00> : vector<1x128xf32>
    %19 = tpu.matmul %17, %18, %cst_12 {dimension_numbers = #tpu.dot_dimension_numbers<[1], [0], [0], [1], [0, 0, 1, 1], [], []>} : vector<1x128xbf16>, vector<128x128xbf16>, vector<1x128xf32> -> vector<1x128xf32>
    %c0_13 = arith.constant 0 : index
    %c0_14 = arith.constant 0 : index
    %20 = vector.load %arg6[%c0_13, %c0_14] : memref<1x128xf32, #tpu.memory_space<vmem>>, vector<1x128xf32>
    %21 = arith.addf %19, %20 : vector<1x128xf32>
    %cst_15 = arith.constant dense<0xFF800000> : vector<1xf32>
    %22 = vector.multi_reduction <maximumf>, %21, %cst_15 [1] : vector<1x128xf32> to vector<1xf32>
    %23 = vector.shape_cast %22 : vector<1xf32> to vector<1x1xf32>
    %24 = vector.broadcast %23 : vector<1x1xf32> to vector<1x128xf32>
    %25 = arith.subf %21, %24 : vector<1x128xf32>
    %26 = math.exp %25 : vector<1x128xf32>
    %cst_16 = arith.constant dense<0.000000e+00> : vector<1xf32>
    %27 = vector.multi_reduction <add>, %26, %cst_16 [1] : vector<1x128xf32> to vector<1xf32>
    %28 = vector.shape_cast %27 : vector<1xf32> to vector<1x1xf32>
    %29 = math.log %28 : vector<1x1xf32>
    %30 = vector.broadcast %29 : vector<1x1xf32> to vector<1x128xf32>
    %31 = arith.subf %25, %30 : vector<1x128xf32>
    %c0_17 = arith.constant 0 : index
    %c0_18 = arith.constant 0 : index
    %c0_19 = arith.constant 0 : index
    %32 = vector.load %arg8[%c0_17, %c0_18, %c0_19] : memref<1x1x128xf32, #tpu.memory_space<vmem>>, vector<1x1x128xf32>
    %33 = vector.shape_cast %32 : vector<1x1x128xf32> to vector<1x128xf32>
    %34 = vector.shape_cast %31 : vector<1x128xf32> to vector<1x1x128xf32>
    tpu.vector_store %arg8[%c0_17, %c0_18, %c0_19], %34 {strides = array<i32>} : memref<1x1x128xf32, #tpu.memory_space<vmem>>, vector<1x1x128xf32>,
    %c4_i32 = arith.constant 4 : i32
    %35 = arith.cmpi eq, %arg0, %c4_i32 : i32
    %36 = arith.extui %35 : i1 to i32
    %c0_i32_20 = arith.constant 0 : i32
    %37 = arith.cmpi ne, %36, %c0_i32_20 : i32
    scf.if %37 {
      %c0_21 = arith.constant 0 : index
      %c0_22 = arith.constant 0 : index
      %38 = vector.load %arg9[%c0_21, %c0_22] : memref<1x128xf32, #tpu.memory_space<vmem>>, vector<1x128xf32>
      tpu.vector_store %arg9[%c0_21, %c0_22], %15 {strides = array<i32>} : memref<1x128xf32, #tpu.memory_space<vmem>>, vector<1x128xf32>,
    } else {
    }
    return
  }
  func.func @transform_0(%arg0: i32, %arg1: memref<5xi32, #tpu.memory_space<smem>>) -> (i32, i32) {
    %c0_i32 = arith.constant 0 : i32
    %c0_i32_0 = arith.constant 0 : i32
    %c0_i32_1 = arith.constant 0 : i32
    return %c0_i32, %c0_i32_0 : i32, i32
  }
  func.func @transform_1(%arg0: i32, %arg1: memref<5xi32, #tpu.memory_space<smem>>) -> (i32, i32) {
    %c0_i32 = arith.constant 0 : i32
    %c0_i32_0 = arith.constant 0 : i32
    %c0_i32_1 = arith.constant 0 : i32
    return %c0_i32, %c0_i32_0 : i32, i32
  }
  func.func @transform_2(%arg0: i32, %arg1: memref<5xi32, #tpu.memory_space<smem>>) -> (i32, i32) {
    %c0_i32 = arith.constant 0 : i32
    %c0_i32_0 = arith.constant 0 : i32
    %c0_i32_1 = arith.constant 0 : i32
    return %c0_i32, %c0_i32_0 : i32, i32
  }
  func.func @transform_3(%arg0: i32, %arg1: memref<5xi32, #tpu.memory_space<smem>>) -> (i32, i32) {
    %c0_i32 = arith.constant 0 : i32
    %c0_i32_0 = arith.constant 0 : i32
    %c0_i32_1 = arith.constant 0 : i32
    return %c0_i32, %c0_i32_0 : i32, i32
  }
  func.func @transform_4(%arg0: i32, %arg1: memref<5xi32, #tpu.memory_space<smem>>) -> (i32, i32) {
    %c0_i32 = arith.constant 0 : i32
    %c0_i32_0 = arith.constant 0 : i32
    %c0_i32_1 = arith.constant 0 : i32
    return %c0_i32, %c0_i32_0 : i32, i32
  }
  func.func @transform_5(%arg0: i32, %arg1: memref<5xi32, #tpu.memory_space<smem>>) -> (i32, i32) {
    %c0_i32 = arith.constant 0 : i32
    %c0_i32_0 = arith.constant 0 : i32
    %c0_i32_1 = arith.constant 0 : i32
    return %c0_i32, %c0_i32_0 : i32, i32
  }
  func.func @transform_6(%arg0: i32, %arg1: memref<5xi32, #tpu.memory_space<smem>>) -> (i32, i32, i32) {
    %c0_i32 = arith.constant 0 : i32
    %c0_i32_0 = arith.constant 0 : i32
    %c0_i32_1 = arith.constant 0 : i32
    return %arg0, %c0_i32, %c0_i32_0 : i32, i32, i32
  }
  func.func @transform_7(%arg0: i32, %arg1: memref<5xi32, #tpu.memory_space<smem>>) -> (i32, i32) {
    %c0_i32 = arith.constant 0 : i32
    %c0_i32_0 = arith.constant 0 : i32
    %c0_i32_1 = arith.constant 0 : i32
    return %c0_i32, %c0_i32_0 : i32, i32
  }
}

</mosaic_0001>

<bundles_post_ra>
// kernel: tpu_custom_call.1
= control target key start
LH: loop header
LB: loop body
LE: loop exit
PB: predicated region body
PF: predicated region fallthrough
CT: control target
= control target key end

     0   :  { %s1040_s27 = smov [#allocation4]   ;;  %s1272_s0 = inlined_call_operand.hbm [shape: s32[5], index: 0, kind: input, shape index: {}]   ;;  %s1273_s1 = inlined_call_operand.hbm [shape: f32[57,128], index: 1, kind: input, shape index: {}]   ;;  %s1274_s2 = inlined_call_operand.hbm [shape: bf16[128,128], index: 2, kind: input, shape index: {}]   ;;  %s1275_s3 = inlined_call_operand.hbm [shape: bf16[128,128], index: 3, kind: input, shape index: {}]   ;;  %s1276_s4 = inlined_call_operand.vmem [shape: f32[1,128], index: 4, kind: input, shape index: {}]   ;;  %s1277_s5 = inlined_call_operand.vmem [shape: f32[1,128], index: 5, kind: input, shape index: {}]   ;;  %s1278_s6 = inlined_call_operand.vmem [shape: f32[1,128], index: 6, kind: input, shape index: {}]   ;;  %s1279_s7 = inlined_call_operand.hbm [shape: f32[5,1,128], index: 7, kind: output, shape index: {0}]   ;;  %s1280_s8 = inlined_call_operand.hbm [shape: f32[1,128], index: 8, kind: output, shape index: {1}]  }
   0x1   :  { %15 = dma.hbm_to_smem %s1272_s0, 16, %s1040_s27, [#allocation3] }
   0x2   :  { %1006 = dma.done.wait [#allocation3], 16 }
   0x3   :  { %1007 = vsyncadd [#allocation3], 4294967280 }
   0x4   :  { %17 = sfence }
   0x5   :  { %18 = vsyncpa [#allocation6], 0 }
   0x6   :  { %19 = vsyncpa [#allocation9], 0 }
   0x7   :  { %20 = vsyncpa [#allocation7], 0 }
   0x8   :  { %22 = vsyncpa [#allocation7 + $0x1], 0 }
   0x9   :  { %23 = vsyncpa [#allocation13], 0  ;;  %s1100_s30 = smov 0   ;;  %s1102_s9 = smov 0  }
   0xa   :  { %s1104_s10 = smov 0   ;;  %s1106_s11 = smov 0  }
   0xb LB: > { %s1121_s0 = sadd.s32 4294967295, %s1038_s11   ;;  %s660_s12 = sadd.s32 4294967294, %s1038_s11   ;;  %s1038_s11 = sphi %s1106_s11, %s1294_s11   ;;  %s1034_s10 = sphi %s1104_s10, %s1293_s10   ;;  %s1030_s9 = sphi %s1102_s9, %s1292_s9   ;;  %s1026_s30 = sphi %s1100_s30, %s1291_s30  }
   0xc   : > { %s1125_s13 = sadd.s32 1, %s1038_s11   ;;  %s162_s14 = sadd.s32 1, %s1034_s10 }
   0xd   : > { %s159_s15 = ssub.s32 %s1038_s11, %s1125_s13  ;;  %p172_p0 = scmp.ne.s32.totalorder %s1034_s10, %s1030_s9 }
   0xe   : > { %p160_p1 = scmp.eq.s32.totalorder %s159_s15, 0  ;;  %p1281_p2 = scmp.eq.s32.totalorder %s1121_s0, 4 }
   0xf   : > { %p178_p3 = scmp.ne.s32.totalorder %s1030_s9, %s1026_s30  ;;  %p179_p4 = scmp.eq.s32.totalorder %s660_s12, 4 }
  0x10   : > { %s1136_s16 = scalar_select %p160_p1, %s1034_s10, %s162_s14  }
  0x11   : > { %p1140_p5 = por %p1281_p2, %p172_p0  ;;  %p1144_p6 = por %p179_p4, %p178_p3 }
  0x12   : > { %p661_p7 = scmp.ge.s32.totalorder %s1038_s11, 1  ;;  %p207_p8 = scmp.lt.s32.totalorder %s1038_s11, 6 }
  0x13   : > { %s1283_s18 = scalar_select %p1144_p6, 1, 0 }
  0x14   : > { %p662_p9 = scmp.ne.s32.totalorder %s1121_s0, 0  ;;  %p782_p10 = scmp.eq.s32.totalorder %s1121_s0, 0 }
  0x15   : > { %p1152_p11 = pnand %p661_p7, %p207_p8  ;;  %s1041_s20 = smov [#allocation8]  }
  0x16   : > { %s232_s21 = sshll.u32 %s1041_s20, 4  ;;  %s1042_s23 = smov [#allocation5]   ;;  %s233_s21 = int_to_ptr.vmem [resolvable:$true] %s232_s21 }
  0x17   : > { %p768_p12 = pneg %p1152_p11  ;;  %s219_s24 = sshll.u32 %s1042_s23, 4  ;;  %s220_s24 = int_to_ptr.vmem [resolvable:$true] %s219_s24 }
  0x18   : > { %s873_s25 = scalar_lea.vmem %s233_s21, 1024  ;;  %p881_p7 = scmp.lt.s32.totalorder %s233_s21, %s233_s21 }
  0x19   : > { %p1160_p13 = pnand %p782_p10, %p768_p12  ;;  %p874_p1 = scmp.ne.s32.totalorder %s233_s21, %s873_s25 }
  0x1a   : > { %p882_p8 = scmp.lt.s32.totalorder %s873_s25, %s873_s25 }
  0x1b   : > { %p864_p0 = pneg %p1160_p13 }
  0x1c   : > { %p883_p2 = por %p882_p8, %p881_p7 }
  0x1d   : > { %p876_p3 = pnand %p874_p1, %p864_p0 }
  0x1f   : > { %p877_p4 = pneg %p876_p3 }
  0x21   : > { %p884_p12 = pnand %p883_p2, %p877_p4 }
  0x23   : > { %887 = shalt.err (!%p884_p12)
}
  0x24   : > { %s1043_s26 = smov 64   ;;  %s1044_s27 = smov 4  }
  0x25   : > { %774 = dma.hbm_to_vmem [thread:$0]  (!%p1160_p13), %s1274_s2, 1024, %s233_s21, [#allocation9], %s1043_s26, %s1043_s26, %s1044_s27  }
  0x26   : > { %s899_s12 = scalar_lea.vmem %s220_s24, 1024  ;;  %p907_p2 = scmp.lt.s32.totalorder %s220_s24, %s220_s24 }
  0x27   : > { %p900_p1 = scmp.ne.s32.totalorder %s220_s24, %s899_s12  ;;  %p908_p4 = scmp.lt.s32.totalorder %s899_s12, %s899_s12 }
  0x29   : > { %p902_p3 = pnand %p900_p1, %p864_p0  ;;  %p909_p8 = por %p908_p4, %p907_p2 }
  0x2b   : > { %p903_p7 = pneg %p902_p3 }
  0x2d   : > { %p910_p12 = pnand %p909_p8, %p903_p7 }
  0x2f   : > { %913 = shalt.err (!%p910_p12)
}
  0x30   : > { %s1045_s14 = smov 128   ;;  %s1046_s15 = smov 8  }
  0x31   : > { %771 = dma.hbm_to_vmem [thread:$0]  (!%p1160_p13), %s1273_s1, 1024, %s220_s24, [#allocation6], %s1045_s14, %s1045_s14, %s1046_s15  }
  0x32   : > { %s1047_s21 = smov [#allocation10]  }
  0x33   : > { %s245_s25 = sshll.u32 %s1047_s21, 4  ;;  %s246_s25 = int_to_ptr.vmem [resolvable:$true] %s245_s25 }
  0x34   : > { %s925_s28 = scalar_lea.vmem %s246_s25, 1024  ;;  %p933_p7 = scmp.lt.s32.totalorder %s246_s25, %s246_s25 }
  0x35   : > { %p926_p1 = scmp.ne.s32.totalorder %s246_s25, %s925_s28  ;;  %p934_p4 = scmp.lt.s32.totalorder %s925_s28, %s925_s28 }
  0x37   : > { %p928_p3 = pnand %p926_p1, %p864_p0  ;;  %p935_p8 = por %p934_p4, %p933_p7 }
  0x39   : > { %p929_p2 = pneg %p928_p3 }
  0x3b   : > { %p936_p12 = pnand %p935_p8, %p929_p2 }
  0x3d   : > { %939 = shalt.err (!%p936_p12)
}
  0x3e   : > { %777 = dma.hbm_to_vmem [thread:$0]  (!%p1160_p13), %s1275_s3, 1024, %s246_s25, [#allocation9], %s1043_s26, %s1043_s26, %s1044_s27  }
  0x3f   : > { %270 = sbr.rel (%p1152_p11) target bundleno = 864 (0x360), region = 44 }
  0x44   : > { %1009 = dma.done.wait (%p782_p10), [#allocation6], 1024  }
  0x45   : > { %1011 = vsyncadd (%p782_p10), [#allocation6], 4294966272 }
  0x46   : > { %1013 = dma.done.wait (%p782_p10), [#allocation9], 2048  }
  0x47   : > { %1015 = vsyncadd (%p782_p10), [#allocation9], 4294965248  ;;  %s300_s22 = sand.u32 1, %s1030_s9   ;;  %308 = sbr.rel (%p662_p9) target bundleno = 78 (0x4e), region = 60 }
  0x48   : > { %s1209_s26 = scalar_lea.vmem [#allocation11], %s300_s22 }
  0x4c   : > { %v309_v0 = vld [vmem:[%s1278_s6] sm:$0x1] }
  0x4d   : > { %310 = vst [vmem:[#allocation2] sm:$0x1] %v309_v0 }
  0x4e PF: > { %v834_v1 = vld [vmem:[#allocation8 + $0x38] sm:$0xff]   ;;  %v1048_v2 = vmov 0.0   ;;  %v835_v3 = vld [vmem:[#allocation8 + $0x30] sm:$0xff]   ;;  %vm1049_vm0 = vmmov 0   ;;  %v836_v4 = vld [vmem:[#allocation8 + $0x28] sm:$0xff]   ;;  %s311_s12 = sld [smem:[#allocation4 + %s1121_s0]] }
  0x4f   : > { %710 = vmatprep.subr.bf16.mxu0 %v1048_v2  ;;  %730 = vmatprep.subr.bf16.mxu1 %v1048_v2  ;;  %v842_v5 = vld [vmem:[#allocation10 + $0x38] sm:$0xff]   ;;  %v837_v6 = vld [vmem:[#allocation8 + $0x20] sm:$0xff]   ;;  %v843_v7 = vld [vmem:[#allocation10 + $0x30] sm:$0xff]   ;;  %vm531_vm1 = vcmask 1040384   ;;  %p686_p9 = scmp.ne.s32.totalorder %s1121_s0, 4 }
  0x50   : > { %711 = vmatpush3.bf16.msra.mxu0 %v834_v1  ;;  %726 = vmatprep.mubr.msk.bf16.mxu0 %vm1049_vm0, %v1048_v2  ;;  %v838_v8 = vld [vmem:[#allocation8 + $0x18] sm:$0xff]   ;;  %v844_v9 = vld [vmem:[#allocation10 + $0x28] sm:$0xff]   ;;  %v839_v10 = vld [vmem:[#allocation8 + $0x10] sm:$0xff]  }
  0x51   : > { %712 = vmatprep.subr.bf16.mxu0 %v1048_v2  ;;  %746 = vmatprep.mubr.msk.bf16.mxu1 %vm1049_vm0, %v1048_v2  ;;  %v845_v11 = vld [vmem:[#allocation10 + $0x20] sm:$0xff]   ;;  %v840_v12 = vld [vmem:[#allocation8 + $0x8] sm:$0xff]   ;;  %v846_v13 = vld [vmem:[#allocation10 + $0x18] sm:$0xff]  }
  0x52   : > { %731 = vmatpush3.bf16.msra.mxu1 %v842_v5  ;;  %v841_v14 = vld [vmem:[#allocation8] sm:$0xff]   ;;  %v847_v16 = vld [vmem:[#allocation10 + $0x10] sm:$0xff]   ;;  %v848_v18 = vld [vmem:[#allocation10 + $0x8] sm:$0xff]  }
  0x53   : > { %732 = vmatprep.subr.bf16.mxu1 %v1048_v2  ;;  %v849_v19 = vld [vmem:[#allocation10] sm:$0xff]   ;;  %v421_v22 = vld [vmem:[%s1276_s4] sm:$0x1] }
  0x54   : > { %713 = vmatpush3.bf16.msra.mxu0 %v835_v3  ;;  %v314_v15 = vld [vmem:[#allocation2] sm:$0x1]  ;;  %s312_s14 = scalar_lea.vmem [#allocation5], %s311_s12 }
  0x55   : > { %714 = vmatprep.subr.bf16.mxu0 %v1048_v2  ;;  %v315_v17 = vpack.c.bf16 %v314_v15, %v314_v15  ;;  %v313_v20 = vld [vmem:[%s312_s14] sm:$0x1] }
  0x56   : > { %733 = vmatpush3.bf16.msra.mxu1 %v843_v7  ;;  %v442_v30 = vld [vmem:[%s1277_s5] sm:$0x1] }
  0x57   : > { %734 = vmatprep.subr.bf16.mxu1 %v1048_v2 }
  0x58   : > { %715 = vmatpush3.bf16.msra.mxu0 %v836_v4 }
  0x59   : > { %716 = vmatprep.subr.bf16.mxu0 %v1048_v2 }
  0x5a   : > { %735 = vmatpush3.bf16.msra.mxu1 %v844_v9 }
  0x5b   : > { %736 = vmatprep.subr.bf16.mxu1 %v1048_v2 }
  0x5c   : > { %717 = vmatpush3.bf16.msra.mxu0 %v837_v6 }
  0x5d   : > { %718 = vmatprep.subr.bf16.mxu0 %v1048_v2 }
  0x5e   : > { %737 = vmatpush3.bf16.msra.mxu1 %v845_v11 }
  0x5f   : > { %738 = vmatprep.subr.bf16.mxu1 %v1048_v2 }
  0x60   : > { %719 = vmatpush3.bf16.msra.mxu0 %v838_v8 }
  0x61   : > { %720 = vmatprep.subr.bf16.mxu0 %v1048_v2 }
  0x62   : > { %739 = vmatpush3.bf16.msra.mxu1 %v846_v13 }
  0x63   : > { %740 = vmatprep.subr.bf16.mxu1 %v1048_v2 }
  0x64   : > { %721 = vmatpush3.bf16.msra.mxu0 %v839_v10 }
  0x65   : > { %722 = vmatprep.subr.bf16.mxu0 %v1048_v2 }
  0x66   : > { %741 = vmatpush3.bf16.msra.mxu1 %v847_v16 }
  0x67   : > { %742 = vmatprep.subr.bf16.mxu1 %v1048_v2 }
  0x68   : > { %723 = vmatpush3.bf16.msra.mxu0 %v840_v12 }
  0x69   : > { %724 = vmatprep.subr.bf16.mxu0 %v1048_v2 }
  0x6a   : > { %743 = vmatpush3.bf16.msra.mxu1 %v848_v18 }
  0x6b   : > { %744 = vmatprep.subr.bf16.mxu1 %v1048_v2 }
  0x6c   : > { %725 = vmatpush3.bf16.msra.mxu0 %v841_v14 }
  0x6e   : > { %745 = vmatpush3.bf16.msra.mxu1 %v849_v19 }
  0x6f   : > { %727 = vmatmul.mubr.bf16.vlgmr.msra.gmra.mxu0 %v315_v17 }
 0x12f   : > { %v414_v21 = vpop.f32.mrf.mxu0 }
 0x130   : > { %v420_v23 = vadd.f32 %v414_v21, %v313_v20 }
 0x131   : > { %v728_v24 = vpop.f32.mrf.mxu0 }
 0x132   : > { %v422_v25 = vadd.f32 %v421_v22, %v420_v23 }
 0x133   : > { %v417_v26 = vpop.f32.mrf.mxu0 }
 0x134   : > { %v423_v27 = vmax.f32 %v422_v25, 0.0 }
 0x135   : > { %v729_v28 = vpop.f32.mrf.mxu0 }
 0x136   : > { %424 = vst [vmem:[#allocation2] sm:$0x1] %v423_v27  ;;  %v425_v29 = vpack.c.bf16 %v423_v27, %v423_v27 }
 0x138   : > { %747 = vmatmul.mubr.bf16.vlgmr.msra.gmra.mxu1 %v425_v29 }
 0x1f8   : > { %v525_v31 = vpop.f32.mrf.mxu1 }
 0x1f9   : > { %v526_v32 = vadd.f32 %v525_v31, %v442_v30 }
 0x1fa   : > { %v748_v33 = vpop.f32.mrf.mxu1 }
 0x1fb   : > { %v532_v34 = vsel %vm531_vm1, %v526_v32, -inf }
 0x1fc   : > { %533 = vmax.xlane.f32.xlu0 %v532_v34  ;;  %v528_v35 = vpop.f32.mrf.mxu1 }
 0x1fe   : > { %v749_v36 = vpop.f32.mrf.mxu1 }
 0x285   : > { %v534_v37 = vpop.xlane.xlu0 %533 }
 0x286   : > { %v535_v38 = vsub.f32 %v526_v32, %v534_v37 }
 0x288   : > { %v536_v39 = vmul.f32 1.442695, %v535_v38 }
 0x28a   : > { %850 = vpow2.f32 %v536_v39 }
 0x297   : > { %v851_v40 = vpop.eup %850 }
 0x298   : > { %v538_v41 = vsel %vm531_vm1, %v851_v40, 0.0 }
 0x299   : > { %539 = vadd.xlane.f32.xlu0 %v538_v41 }
 0x322   : > { %v540_v42 = vpop.xlane.xlu0 %539 }
 0x323   : > { %852 = vlog2.f32 %v540_v42 }
 0x330   : > { %v853_v43 = vpop.eup %852 }
 0x331   : > { %v542_v44 = vmul.f32 0.6931472, %v853_v43  ;;  %548 = sbr.rel (%p686_p9) target bundleno = 823 (0x337), region = 64 }
 0x333   : > { %v543_v45 = vsub.f32 %v535_v38, %v542_v44 }
 0x335   : > { %544 = vst [vmem:[%s1209_s26] sm:$0x1] %v543_v45 }
 0x336   : > { %549 = vst [vmem:[#allocation12] sm:$0x1] %v423_v27 }
 0x337 PF: > { %s687_s25 = sshll.u32 %s1121_s0, 4  ;;  %s563_s19 = sshll.u32 %s1209_s26, 4  ;;  %s564_s19 = int_to_ptr.vmem [resolvable:$true] %s563_s19 }
 0x338   : > { %s561_s29 = scalar_lea.hbm %s1279_s7, %s687_s25  ;;  %s551_s27 = scalar_lea.sflag [#allocation7], %s300_s22 }
 0x339   : > { %s940_s12 = scalar_lea.vmem %s564_s19, 16  ;;  %s1050_s14 = smov [#allocation11]  }
 0x33a   : > { %p941_p10 = scmp.ne.s32.totalorder %s564_s19, %s940_s12  ;;  %s944_s15 = sshll.u32 %s1050_s14, 4  ;;  %s945_s15 = int_to_ptr.vmem [resolvable:$false] %s944_s15 }
 0x33b   : > { %s946_s20 = scalar_lea.vmem %s945_s15, 32  ;;  %p947_p0 = scmp.lt.s32.totalorder %s564_s19, %s945_s15 }
 0x33c   : > { %p942_p11 = pnand %p941_p10, %p1140_p5  ;;  %p948_p1 = scmp.lt.s32.totalorder %s946_s20, %s940_s12 }
 0x33e   : > { %p943_p13 = pneg %p942_p11  ;;  %p949_p3 = por %p948_p1, %p947_p0 }
 0x340   : > { %p950_p2 = pnand %p949_p3, %p943_p13 }
 0x342   : > { %953 = shalt.err (!%p950_p2)
}
 0x343   : > { %s954_s23 = scalar_lea.hbm %s561_s29, 16  ;;  %s958_s21 = scalar_lea.hbm %s1279_s7, 80 }
 0x344   : > { %p955_p7 = scmp.ne.s32.totalorder %s561_s29, %s954_s23  ;;  %p959_p12 = scmp.lt.s32.totalorder %s561_s29, %s1279_s7 }
 0x345   : > { %p960_p9 = scmp.lt.s32.totalorder %s958_s21, %s954_s23 }
 0x346   : > { %p956_p4 = pnand %p955_p7, %p1140_p5 }
 0x347   : > { %p961_p10 = por %p960_p9, %p959_p12 }
 0x348   : > { %p957_p8 = pneg %p956_p4 }
 0x34a   : > { %p962_p11 = pnand %p961_p10, %p957_p8 }
 0x34c   : > { %965 = shalt.err (!%p962_p11)
}
 0x34d   : > { %762 = dma.vmem_to_hbm [thread:$0]  (%p1140_p5), %s564_s19, 16, %s561_s29, %s551_s27  }
 0x34e   : > { %s1051_s24 = smov [#allocation12]   ;;  %p1286_p0 = scmp.eq.s32.totalorder %s1121_s0, 4 }
 0x34f   : > { %s574_s12 = sshll.u32 %s1051_s24, 4  ;;  %s575_s12 = int_to_ptr.vmem [resolvable:$true] %s574_s12 }
 0x350   : > { %s966_s14 = scalar_lea.vmem %s575_s12, 16  ;;  %s972_s15 = scalar_lea.vmem %s575_s12, 32 }
 0x351   : > { %p967_p13 = scmp.ne.s32.totalorder %s575_s12, %s966_s14  ;;  %p973_p2 = scmp.lt.s32.totalorder %s575_s12, %s575_s12 }
 0x352   : > { %p974_p7 = scmp.lt.s32.totalorder %s972_s15, %s966_s14 }
 0x353   : > { %p968_p1 = pnand %p967_p13, %p1286_p0 }
 0x354   : > { %p975_p4 = por %p974_p7, %p973_p2 }
 0x355   : > { %p969_p3 = pneg %p968_p1 }
 0x357   : > { %p976_p6 = pnand %p975_p4, %p969_p3 }
 0x359   : > { %979 = shalt.err (!%p976_p6)
}
 0x35a   : > { %p1287_p8 = pmov %p1286_p0  ;;  %p1288_p5 = pmov %p1286_p0 }
 0x35c   : > { %764 = dma.vmem_to_hbm [thread:$0]  (%p1287_p8), %s575_s12, 16, %s1280_s8, [#allocation13]  }
 0x35d   : > { %1017 = dma.done.wait (%p1288_p5), [#allocation13], 16   ;;  %p1289_p12 = pmov %p1286_p0 }
 0x35f   : > { %1019 = vsyncadd (%p1289_p12), [#allocation13], 4294967280 }
 0x360 PF: > { %p790_p9 = scmp.ge.s32.totalorder %s1038_s11, 2  ;;  %s590_s29 = sand.u32 1, %s1026_s30  }
 0x361   : > { %p1290_p10 = scmp.ne.s32.totalorder %s1283_s18, 0  ;;  %s591_s19 = scalar_lea.sflag [#allocation7], %s590_s29 }
 0x363   : > { %p779_p6 = pnand %p790_p9, %p1290_p10 }
 0x365   : > { %p780_p11 = pneg %p779_p6 }
 0x367   : > { %1021 = dma.done.wait (%p780_p11), %s591_s19, 16  }
 0x368   : > { %1023 = vsyncadd (%p780_p11), %s591_s19, 4294967280  ;;  %p26_p13 = scmp.ge.s32.totalorder %s1125_s13, 7   ;;  %s1291_s30 = smov %s1030_s9 }
 0x369   : > { %s1292_s9 = smov %s1034_s10  ;;  %s1293_s10 = smov %s1136_s16 }
 0x36a   : > { %s1294_s11 = smov %s1125_s13  ;;  %28 = sbr.rel (!%p26_p13) target bundleno = 11 (0xb), region = 106 }
 0x36f   :  { %595 = vsyncpa [#allocation6], 1 }
 0x370   :  { %597 = vsyncpa [#allocation6 + $0x1], 1 }
 0x371   :  { %598 = vsyncpa [#allocation9], 1 }
 0x372   :  { %599 = vsyncpa [#allocation7], 1 }
 0x373   :  { %601 = vsyncpa [#allocation7 + $0x1], 1 }
 0x374   :  { %602 = vsyncpa [#allocation13], 1 }

</bundles_post_ra>
